<compile_context>
chip_gen: v6e
topology: v6e:2x2x1
jax: 0.10.0
libtpu: 0.0.40
codegen_flags: <defaults>
</compile_context>

<pallas_src>
import jax
import jax.numpy as jnp
from jax import lax
from jax.experimental import pallas as pl
from jax.experimental.pallas import tpu as pltpu

LN_EPS = 1e-5  # nn.LayerNorm default


def mlp_kernel(x_ref, w1_ref, b1_ref, gamma_ref, beta_ref, w2_ref, b2_ref, o_ref):
    # x_ref: (tm, D)  w1_ref: (D, H)        -- input dtype (f32 or bf16), MXU inputs
    # b1/gamma/beta/w2_ref: (1, H) f32      -- resident constants
    # b2_ref: (1,) f32 in SMEM              -- scalar head bias
    # o_ref: (1, tm)                        -- lane-dense output row

    # Linear 1 on the MXU; accumulate in f32 regardless of input dtype.
    h = jnp.dot(x_ref[...], w1_ref[...], preferred_element_type=jnp.float32)
    h = h + b1_ref[...]  # f32

    # LayerNorm over the hidden (last) dim -- all statistics in f32.
    mu = jnp.mean(h, axis=-1, keepdims=True)
    diff = h - mu
    var = jnp.mean(diff * diff, axis=-1, keepdims=True)
    hn = diff * lax.rsqrt(var + LN_EPS)
    hn = hn * gamma_ref[...] + beta_ref[...]

    # ReLU
    hn = jnp.maximum(hn, 0.0)

    # Dropout: eval-mode forward is identity.
    # TODO(synk): add pltpu.prng_random_bits-based mask + 1/(1-p) scaling for train mode.

    # Regression head as a lane-dense (1, tm) row:
    #   (1, H) . (tm, H) contracted over H  ->  (1, tm)
    out_row = lax.dot_general(
        w2_ref[...], hn,
        dimension_numbers=(((1,), (1,)), ((), ())),
        preferred_element_type=jnp.float32,
    )
    o_ref[...] = (out_row + b2_ref[0]).astype(o_ref.dtype)


def _pick_batch_tile(B):
    if B <= 1024:
        return B  # single grid step for small problems
    for t in (1024, 512, 256, 128, 64, 32, 16, 8):
        if B % t == 0:
            return t
    return B


def mlp_forward(x, w1, b1, gamma, beta, w2, b2, *, tm=None):
    """x: (B, D); w1: (D, H); b1/gamma/beta: (H,); w2: (H, 1); b2: (1,) -> (B, 1)."""
    B, D = x.shape
    H = w1.shape[1]
    if tm is None:
        tm = _pick_batch_tile(B)
    assert B % tm == 0, "batch must be a multiple of the batch tile"

    # Small parameters are kept in f32 (LN math stays f32 even on the bf16 path)
    # and reshaped to clean 2-D VMEM rows.
    b1_2d = b1.reshape(1, H).astype(jnp.float32)
    gamma_2d = gamma.reshape(1, H).astype(jnp.float32)
    beta_2d = beta.reshape(1, H).astype(jnp.float32)
    w2_row = w2.reshape(1, H).astype(jnp.float32)   # (H, 1) -> (1, H)
    b2_s = b2.reshape(1).astype(jnp.float32)        # SMEM scalar

    # NOTE(v7x): at D = H = 128 a resident W1 is tiny. If H grows (e.g. >= 4096),
    # add a grid axis over H with a VMEM accumulator instead of keeping W1 resident,
    # and budget against v7x's 64 MiB VMEM (32 MiB scoped default).
    out_row = pl.pallas_call(
        mlp_kernel,
        out_shape=jax.ShapeDtypeStruct((1, B), x.dtype),
        grid_spec=pltpu.PrefetchScalarGridSpec(
            num_scalar_prefetch=0,
            grid=(B // tm,),
            in_specs=[
                pl.BlockSpec((tm, D), lambda i: (i, 0)),   # x tile
                pl.BlockSpec((D, H), lambda i: (0, 0)),    # W1 (resident)
                pl.BlockSpec((1, H), lambda i: (0, 0)),    # b1
                pl.BlockSpec((1, H), lambda i: (0, 0)),    # LN gamma
                pl.BlockSpec((1, H), lambda i: (0, 0)),    # LN beta
                pl.BlockSpec((1, H), lambda i: (0, 0)),    # w2 row
                pl.BlockSpec(memory_space=pltpu.MemorySpace.SMEM),  # b2 scalar
            ],
            out_specs=pl.BlockSpec((1, tm), lambda i: (0, i)),  # lane-dense row
        ),
        compiler_params=pltpu.CompilerParams(
            dimension_semantics=("parallel",)),
    )(x, w1, b1_2d, gamma_2d, beta_2d, w2_row, b2_s)

    return out_row.reshape(B, 1)


def reference_forward(x, w1, b1, gamma, beta, w2, b2):
    h = x.astype(jnp.float32) @ w1.astype(jnp.float32) + b1.astype(jnp.float32)
    mu = jnp.mean(h, axis=-1, keepdims=True)
    var = jnp.mean((h - mu) ** 2, axis=-1, keepdims=True)
    hn = (h - mu) / jnp.sqrt(var + LN_EPS) * gamma + beta
    hn = jnp.maximum(hn, 0.0)
    return hn @ w2.astype(jnp.float32) + b2


if __name__ == "__main__":
    # Small shapes consistent with the module (config sets hidden_size = input_size).
    B, D = 256, 128
    H = D

    key = jax.random.PRNGKey(0)
    kx, kw1, kb1, kw2, kb2 = jax.random.split(key, 5)

    x = jax.random.normal(kx, (B, D), dtype=jnp.float32)

    # Deterministic PyTorch-Linear-style uniform init; weights pre-transposed to [in, out].
    bound1 = 1.0 / (D ** 0.5)
    w1 = jax.random.uniform(kw1, (D, H), jnp.float32, -bound1, bound1)
    b1 = jax.random.uniform(kb1, (H,), jnp.float32, -bound1, bound1)
    gamma = jnp.ones((H,), jnp.float32)   # nn.LayerNorm default weight
    beta = jnp.zeros((H,), jnp.float32)   # nn.LayerNorm default bias
    bound2 = 1.0 / (H ** 0.5)
    w2 = jax.random.uniform(kw2, (H, 1), jnp.float32, -bound2, bound2)
    b2 = jax.random.uniform(kb2, (1,), jnp.float32, -bound2, bound2)

    # f32 path (correctness check against the JAX reference).
    out = mlp_forward(x, w1, b1, gamma, beta, w2, b2)
    jax.block_until_ready(out)
    ref = reference_forward(x, w1, b1, gamma, beta, w2, b2)
    assert out.shape == (B, 1)
    assert jnp.allclose(out, ref, atol=1e-4, rtol=1e-4), "f32 mismatch vs JAX reference"

    # bf16 matmul-input path (v6e/v7x MXU-friendly); LN math stays f32 in-kernel.
    x_bf, w1_bf = x.astype(jnp.bfloat16), w1.astype(jnp.bfloat16)
    out_bf = mlp_forward(x_bf, w1_bf, b1, gamma, beta, w2, b2)
    jax.block_until_ready(out_bf)
    ref_bf = reference_forward(x_bf.astype(jnp.float32), w1_bf.astype(jnp.float32),
                               b1, gamma, beta, w2, b2)
    assert jnp.allclose(out_bf.astype(jnp.float32), ref_bf, atol=2e-2, rtol=2e-2), \
        "bf16 mismatch vs JAX reference"

    print("KERNEL_OK")
</pallas_src>

<mosaic_0001>
module attributes {stable_mosaic.version = 11 : i64} {
  func.func @mlp_kernel(%arg0: i32, %arg1: memref<256x128xf32, #tpu.memory_space<vmem>>, %arg2: memref<128x128xf32, #tpu.memory_space<vmem>>, %arg3: memref<1x128xf32, #tpu.memory_space<vmem>>, %arg4: memref<1x128xf32, #tpu.memory_space<vmem>>, %arg5: memref<1x128xf32, #tpu.memory_space<vmem>>, %arg6: memref<1x128xf32, #tpu.memory_space<vmem>>, %arg7: memref<1xf32, #tpu.memory_space<smem>>, %arg8: memref<1x256xf32, #tpu.memory_space<vmem>>) attributes {dimension_semantics = [#tpu.dimension_semantics<parallel>], iteration_bounds = array<i64: 1>, scalar_prefetch = 0 : i64, scratch_operands = 0 : i64, tpu.core_type = #tpu.core_type<tc>, window_params = [{transform_indices = @transform_0, window_bounds = array<i64: 256, 128>}, {pipeline_mode = #tpu.pipeline_mode<synchronous>, transform_indices = @transform_1, window_bounds = array<i64: 128, 128>}, {pipeline_mode = #tpu.pipeline_mode<synchronous>, transform_indices = @transform_2, window_bounds = array<i64: 1, 128>}, {pipeline_mode = #tpu.pipeline_mode<synchronous>, transform_indices = @transform_3, window_bounds = array<i64: 1, 128>}, {pipeline_mode = #tpu.pipeline_mode<synchronous>, transform_indices = @transform_4, window_bounds = array<i64: 1, 128>}, {pipeline_mode = #tpu.pipeline_mode<synchronous>, transform_indices = @transform_5, window_bounds = array<i64: 1, 128>}, {transform_indices = @transform_6, window_bounds = array<i64: 1>}, {transform_indices = @transform_7, window_bounds = array<i64: 1, 256>}]} {
    %c0 = arith.constant 0 : index
    %c0_0 = arith.constant 0 : index
    %0 = vector.load %arg1[%c0, %c0_0] : memref<256x128xf32, #tpu.memory_space<vmem>>, vector<256x128xf32>
    %c0_1 = arith.constant 0 : index
    %c0_2 = arith.constant 0 : index
    %1 = vector.load %arg2[%c0_1, %c0_2] : memref<128x128xf32, #tpu.memory_space<vmem>>, vector<128x128xf32>
    %cst = arith.constant dense<0.000000e+00> : vector<256x128xf32>
    %2 = tpu.matmul %0, %1, %cst {dimension_numbers = #tpu.dot_dimension_numbers<[1], [0], [0], [1], [0, 0, 1, 1], [], []>} : vector<256x128xf32>, vector<128x128xf32>, vector<256x128xf32> -> vector<256x128xf32>
    %c0_3 = arith.constant 0 : index
    %c0_4 = arith.constant 0 : index
    %3 = vector.load %arg3[%c0_3, %c0_4] : memref<1x128xf32, #tpu.memory_space<vmem>>, vector<1x128xf32>
    %4 = vector.broadcast %3 : vector<1x128xf32> to vector<256x128xf32>
    %5 = arith.addf %2, %4 : vector<256x128xf32>
    %cst_5 = arith.constant dense<0.000000e+00> : vector<256xf32>
    %6 = vector.multi_reduction <add>, %5, %cst_5 [1] : vector<256x128xf32> to vector<256xf32>
    %7 = vector.shape_cast %6 : vector<256xf32> to vector<256x1xf32>
    %cst_6 = arith.constant 1.280000e+02 : f32
    %8 = vector.broadcast %cst_6 : f32 to vector<256x1xf32>
    %9 = arith.divf %7, %8 : vector<256x1xf32>
    %10 = vector.broadcast %9 : vector<256x1xf32> to vector<256x128xf32>
    %11 = arith.subf %5, %10 : vector<256x128xf32>
    %12 = arith.mulf %11, %11 : vector<256x128xf32>
    %cst_7 = arith.constant dense<0.000000e+00> : vector<256xf32>
    %13 = vector.multi_reduction <add>, %12, %cst_7 [1] : vector<256x128xf32> to vector<256xf32>
    %14 = vector.shape_cast %13 : vector<256xf32> to vector<256x1xf32>
    %cst_8 = arith.constant 1.280000e+02 : f32
    %15 = vector.broadcast %cst_8 : f32 to vector<256x1xf32>
    %16 = arith.divf %14, %15 : vector<256x1xf32>
    %cst_9 = arith.constant 9.99999974E-6 : f32
    %17 = vector.broadcast %cst_9 : f32 to vector<256x1xf32>
    %18 = arith.addf %16, %17 : vector<256x1xf32>
    %19 = math.rsqrt %18 : vector<256x1xf32>
    %20 = vector.broadcast %19 : vector<256x1xf32> to vector<256x128xf32>
    %21 = arith.mulf %11, %20 : vector<256x128xf32>
    %c0_10 = arith.constant 0 : index
    %c0_11 = arith.constant 0 : index
    %22 = vector.load %arg4[%c0_10, %c0_11] : memref<1x128xf32, #tpu.memory_space<vmem>>, vector<1x128xf32>
    %23 = vector.broadcast %22 : vector<1x128xf32> to vector<256x128xf32>
    %24 = arith.mulf %21, %23 : vector<256x128xf32>
    %c0_12 = arith.constant 0 : index
    %c0_13 = arith.constant 0 : index
    %25 = vector.load %arg5[%c0_12, %c0_13] : memref<1x128xf32, #tpu.memory_space<vmem>>, vector<1x128xf32>
    %26 = vector.broadcast %25 : vector<1x128xf32> to vector<256x128xf32>
    %27 = arith.addf %24, %26 : vector<256x128xf32>
    %cst_14 = arith.constant 0.000000e+00 : f32
    %28 = vector.broadcast %cst_14 : f32 to vector<256x128xf32>
    %29 = arith.maximumf %27, %28 : vector<256x128xf32>
    %c0_15 = arith.constant 0 : index
    %c0_16 = arith.constant 0 : index
    %30 = vector.load %arg6[%c0_15, %c0_16] : memref<1x128xf32, #tpu.memory_space<vmem>>, vector<1x128xf32>
    %cst_17 = arith.constant dense<0.000000e+00> : vector<1x256xf32>
    %31 = tpu.matmul %30, %29, %cst_17 {dimension_numbers = #tpu.dot_dimension_numbers<[1], [1], [0], [0], [0, 0, 1, 0], [], []>} : vector<1x128xf32>, vector<256x128xf32>, vector<1x256xf32> -> vector<1x256xf32>
    %c0_18 = arith.constant 0 : index
    %32 = memref.load %arg7[%c0_18] : memref<1xf32, #tpu.memory_space<smem>>
    %33 = vector.broadcast %32 : f32 to vector<1x256xf32>
    %34 = arith.addf %31, %33 : vector<1x256xf32>
    %c0_19 = arith.constant 0 : index
    %c0_20 = arith.constant 0 : index
    %35 = vector.load %arg8[%c0_19, %c0_20] : memref<1x256xf32, #tpu.memory_space<vmem>>, vector<1x256xf32>
    tpu.vector_store %arg8[%c0_19, %c0_20], %34 {strides = array<i32>} : memref<1x256xf32, #tpu.memory_space<vmem>>, vector<1x256xf32>,
    return
  }
  func.func @transform_0(%arg0: i32) -> (i32, i32) {
    %c0_i32 = arith.constant 0 : i32
    %c0_i32_0 = arith.constant 0 : i32
    return %arg0, %c0_i32 : i32, i32
  }
  func.func @transform_1(%arg0: i32) -> (i32, i32) {
    %c0_i32 = arith.constant 0 : i32
    %c0_i32_0 = arith.constant 0 : i32
    %c0_i32_1 = arith.constant 0 : i32
    return %c0_i32, %c0_i32_0 : i32, i32
  }
  func.func @transform_2(%arg0: i32) -> (i32, i32) {
    %c0_i32 = arith.constant 0 : i32
    %c0_i32_0 = arith.constant 0 : i32
    %c0_i32_1 = arith.constant 0 : i32
    return %c0_i32, %c0_i32_0 : i32, i32
  }
  func.func @transform_3(%arg0: i32) -> (i32, i32) {
    %c0_i32 = arith.constant 0 : i32
    %c0_i32_0 = arith.constant 0 : i32
    %c0_i32_1 = arith.constant 0 : i32
    return %c0_i32, %c0_i32_0 : i32, i32
  }
  func.func @transform_4(%arg0: i32) -> (i32, i32) {
    %c0_i32 = arith.constant 0 : i32
    %c0_i32_0 = arith.constant 0 : i32
    %c0_i32_1 = arith.constant 0 : i32
    return %c0_i32, %c0_i32_0 : i32, i32
  }
  func.func @transform_5(%arg0: i32) -> (i32, i32) {
    %c0_i32 = arith.constant 0 : i32
    %c0_i32_0 = arith.constant 0 : i32
    %c0_i32_1 = arith.constant 0 : i32
    return %c0_i32, %c0_i32_0 : i32, i32
  }
  func.func @transform_6(%arg0: i32) -> i32 {
    %c0_i32 = arith.constant 0 : i32
    %c0_i32_0 = arith.constant 0 : i32
    return %c0_i32 : i32
  }
  func.func @transform_7(%arg0: i32) -> (i32, i32) {
    %c0_i32 = arith.constant 0 : i32
    %c0_i32_0 = arith.constant 0 : i32
    return %c0_i32, %arg0 : i32, i32
  }
}

</mosaic_0001>

<bundles_post_ra>
// kernel: tpu_custom_call.1
= control target key start
LH: loop header
LB: loop body
LE: loop exit
PB: predicated region body
PF: predicated region fallthrough
CT: control target
= control target key end

     0   :  { %13 = vsyncpa [#allocation4], 0  ;;  %s1707_s0 = inlined_call_operand.hbm [shape: f32[256,128], index: 0, kind: input, shape index: {}]   ;;  %s1708_s1 = inlined_call_operand.hbm [shape: f32[128,128], index: 1, kind: input, shape index: {}]   ;;  %s1709_s2 = inlined_call_operand.vmem [shape: f32[1,128], index: 2, kind: input, shape index: {}]   ;;  %s1710_s3 = inlined_call_operand.vmem [shape: f32[1,128], index: 3, kind: input, shape index: {}]   ;;  %s1711_s4 = inlined_call_operand.vmem [shape: f32[1,128], index: 4, kind: input, shape index: {}]   ;;  %s1712_s5 = inlined_call_operand.vmem [shape: f32[1,128], index: 5, kind: input, shape index: {}]   ;;  %s1713_s6 = inlined_call_operand.<no memory space> [shape: f32[1], index: 6, kind: input, shape index: {}]   ;;  %s1714_s7 = inlined_call_operand.hbm [shape: f32[1,256], index: 7, kind: output, shape index: {}]  }
   0x1   :  { %14 = vsyncpa [#allocation7], 0 }
   0x2   :  { %15 = vsyncpa [#allocation5], 0  ;;  %s1213_s24 = smov [#allocation3]  }
   0x3   :  { %s21_s25 = sshll.u32 %s1213_s24, 4  ;;  %s22_s25 = int_to_ptr.vmem [resolvable:$true] %s21_s25 }
   0x4   :  { %s1155_s26 = scalar_lea.vmem %s22_s25, 4096  ;;  %p1160_p1 = scmp.lt.s32.totalorder %s22_s25, %s22_s25 }
   0x5   :  { %p1156_p0 = scmp.ne.s32.totalorder %s22_s25, %s1155_s26  ;;  %p1161_p2 = scmp.lt.s32.totalorder %s1155_s26, %s1155_s26 }
   0x7   :  { %p1162_p3 = por %p1161_p2, %p1160_p1 }
   0x9   :  { %p1163_p4 = pnand %p1162_p3, %p1156_p0 }
   0xb   :  { %1166 = shalt.err (!%p1163_p4)
}
   0xc   :  { %s1214_s27 = smov 128   ;;  %s1215_s28 = smov 8  }
   0xd   :  { %27 = dma.hbm_to_vmem [thread:$0]  %s1707_s0, 4096, %s22_s25, [#allocation4], %s1214_s27, %s1214_s27, %s1215_s28  }
   0xe   :  { %s1216_s8 = smov [#allocation6]  }
   0xf   :  { %s33_s9 = sshll.u32 %s1216_s8, 4  ;;  %s34_s9 = int_to_ptr.vmem [resolvable:$true] %s33_s9 }
  0x10   :  { %s1175_s10 = scalar_lea.vmem %s34_s9, 2048  ;;  %p1180_p6 = scmp.lt.s32.totalorder %s34_s9, %s34_s9 }
  0x11   :  { %p1176_p5 = scmp.ne.s32.totalorder %s34_s9, %s1175_s10  ;;  %p1181_p7 = scmp.lt.s32.totalorder %s1175_s10, %s1175_s10 }
  0x13   :  { %p1182_p8 = por %p1181_p7, %p1180_p6 }
  0x15   :  { %p1183_p9 = pnand %p1182_p8, %p1176_p5 }
  0x17   :  { %1186 = shalt.err (!%p1183_p9)
}
  0x18   :  { %39 = dma.hbm_to_vmem [thread:$0]  %s1708_s1, 2048, %s34_s9, [#allocation7], %s1214_s27, %s1214_s27, %s1215_s28  }
  0x19   :  { %1207 = dma.done.wait [#allocation4], 4096  }
  0x1a   :  { %1208 = vsyncadd [#allocation4], 4294963200 }
  0x1b   :  { %1209 = dma.done.wait [#allocation7], 2048  }
  0x1c   :  { %1210 = vsyncadd [#allocation7], 4294965248  ;;  %v103_v0 = vld [vmem:[#allocation6 + $0x78] sm:$0xff]  ;;  %v102_v1 = vld [vmem:[#allocation6 + $0x70] sm:$0xff]  ;;  %s1218_s17 = smov [#allocation8]  }
  0x1d   :  { %997 = vmatprep.subr.mxu0 %v103_v0  ;;  %v101_v2 = vld [vmem:[#allocation6 + $0x68] sm:$0xff]  ;;  %v100_v3 = vld [vmem:[#allocation6 + $0x60] sm:$0xff]  ;;  %v99_v5 = vld [vmem:[#allocation6 + $0x58] sm:$0xff]  ;;  %s902_s18 = sshll.u32 %s1218_s17, 4  ;;  %s903_s18 = int_to_ptr.vmem [resolvable:$true] %s902_s18 }
  0x1e   :  { %998 = vmatpush3.msra.mxu0 %v103_v0  ;;  %v56_v4 = vld [vmem:[#allocation3] sm:$0xff]  ;;  %v98_v6 = vld [vmem:[#allocation6 + $0x50] sm:$0xff]  ;;  %v97_v7 = vld [vmem:[#allocation6 + $0x48] sm:$0xff]  ;;  %s1187_s19 = scalar_lea.vmem %s903_s18, 32  ;;  %p1192_p11 = scmp.lt.s32.totalorder %s903_s18, %s903_s18 }
  0x1f   :  { %999 = vmatprep.subr.mxu0 %v102_v1  ;;  %1029 = vmatprep.mubr.f32.mxu0 %v56_v4  ;;  %v96_v8 = vld [vmem:[#allocation6 + $0x40] sm:$0xff]  ;;  %v95_v9 = vld [vmem:[#allocation6 + $0x38] sm:$0xff]  ;;  %v94_v10 = vld [vmem:[#allocation6 + $0x30] sm:$0xff]  ;;  %p1188_p10 = scmp.ne.s32.totalorder %s903_s18, %s1187_s19  ;;  %p1193_p12 = scmp.lt.s32.totalorder %s1187_s19, %s1187_s19 }
  0x20   :  { %1000 = vmatpush3.msra.mxu0 %v102_v1  ;;  %v93_v11 = vld [vmem:[#allocation6 + $0x28] sm:$0xff]  ;;  %v92_v12 = vld [vmem:[#allocation6 + $0x20] sm:$0xff]  ;;  %v91_v13 = vld [vmem:[#allocation6 + $0x18] sm:$0xff] }
  0x21   :  { %1001 = vmatprep.subr.mxu0 %v101_v2  ;;  %v90_v14 = vld [vmem:[#allocation6 + $0x10] sm:$0xff]  ;;  %v89_v15 = vld [vmem:[#allocation6 + $0x8] sm:$0xff]  ;;  %v88_v16 = vld [vmem:[#allocation6] sm:$0xff]  ;;  %p1194_p13 = por %p1193_p12, %p1192_p11 }
  0x22   :  { %1002 = vmatpush3.msra.mxu0 %v101_v2  ;;  %v57_v17 = vld [vmem:[#allocation3 + $0x8] sm:$0xff]  ;;  %v58_v18 = vld [vmem:[#allocation3 + $0x10] sm:$0xff]  ;;  %v59_v19 = vld [vmem:[#allocation3 + $0x18] sm:$0xff] }
  0x23   :  { %1003 = vmatprep.subr.mxu0 %v100_v3  ;;  %v60_v20 = vld [vmem:[#allocation3 + $0x20] sm:$0xff]  ;;  %v61_v21 = vld [vmem:[#allocation3 + $0x28] sm:$0xff]  ;;  %v62_v22 = vld [vmem:[#allocation3 + $0x30] sm:$0xff]  ;;  %p1195_p0 = pnand %p1194_p13, %p1188_p10 }
  0x24   :  { %1004 = vmatpush3.msra.mxu0 %v100_v3  ;;  %v63_v23 = vld [vmem:[#allocation3 + $0x38] sm:$0xff]  ;;  %v64_v24 = vld [vmem:[#allocation3 + $0x40] sm:$0xff]  ;;  %v65_v25 = vld [vmem:[#allocation3 + $0x48] sm:$0xff] }
  0x25   :  { %1005 = vmatprep.subr.mxu0 %v99_v5  ;;  %v66_v26 = vld [vmem:[#allocation3 + $0x50] sm:$0xff]  ;;  %v67_v27 = vld [vmem:[#allocation3 + $0x58] sm:$0xff]  ;;  %v68_v28 = vld [vmem:[#allocation3 + $0x60] sm:$0xff] }
  0x26   :  { %1006 = vmatpush3.msra.mxu0 %v99_v5  ;;  %v69_v29 = vld [vmem:[#allocation3 + $0x68] sm:$0xff]  ;;  %v70_v30 = vld [vmem:[#allocation3 + $0x70] sm:$0xff]  ;;  %v71_v31 = vld [vmem:[#allocation3 + $0x78] sm:$0xff] }
  0x27   :  { %1007 = vmatprep.subr.mxu0 %v98_v6  ;;  %v72_v32 = vld [vmem:[#allocation3 + $0x80] sm:$0xff]  ;;  %v73_v33 = vld [vmem:[#allocation3 + $0x88] sm:$0xff]  ;;  %v74_v34 = vld [vmem:[#allocation3 + $0x90] sm:$0xff] }
  0x28   :  { %1008 = vmatpush3.msra.mxu0 %v98_v6  ;;  %v75_v35 = vld [vmem:[#allocation3 + $0x98] sm:$0xff]  ;;  %v76_v36 = vld [vmem:[#allocation3 + $0xa0] sm:$0xff]  ;;  %v77_v37 = vld [vmem:[#allocation3 + $0xa8] sm:$0xff] }
  0x29   :  { %1009 = vmatprep.subr.mxu0 %v97_v7  ;;  %v78_v38 = vld [vmem:[#allocation3 + $0xb0] sm:$0xff]  ;;  %v79_v39 = vld [vmem:[#allocation3 + $0xb8] sm:$0xff]  ;;  %v80_v40 = vld [vmem:[#allocation3 + $0xc0] sm:$0xff] }
  0x2a   :  { %1010 = vmatpush3.msra.mxu0 %v97_v7  ;;  %v81_v41 = vld [vmem:[#allocation3 + $0xc8] sm:$0xff]  ;;  %v82_v42 = vld [vmem:[#allocation3 + $0xd0] sm:$0xff]  ;;  %v83_v43 = vld [vmem:[#allocation3 + $0xd8] sm:$0xff] }
  0x2b   :  { %1011 = vmatprep.subr.mxu0 %v96_v8  ;;  %v84_v44 = vld [vmem:[#allocation3 + $0xe0] sm:$0xff]  ;;  %v85_v45 = vld [vmem:[#allocation3 + $0xe8] sm:$0xff]  ;;  %v86_v46 = vld [vmem:[#allocation3 + $0xf0] sm:$0xff] }
  0x2c   :  { %1012 = vmatpush3.msra.mxu0 %v96_v8  ;;  %v87_v47 = vld [vmem:[#allocation3 + $0xf8] sm:$0xff] }
  0x2d   :  { %1013 = vmatprep.subr.mxu0 %v95_v9 }
  0x2e   :  { %1014 = vmatpush3.msra.mxu0 %v95_v9 }
  0x2f   :  { %1015 = vmatprep.subr.mxu0 %v94_v10 }
  0x30   :  { %1016 = vmatpush3.msra.mxu0 %v94_v10 }
  0x31   :  { %1017 = vmatprep.subr.mxu0 %v93_v11 }
  0x32   :  { %1018 = vmatpush3.msra.mxu0 %v93_v11 }
  0x33   :  { %1019 = vmatprep.subr.mxu0 %v92_v12 }
  0x34   :  { %1020 = vmatpush3.msra.mxu0 %v92_v12 }
  0x35   :  { %1021 = vmatprep.subr.mxu0 %v91_v13 }
  0x36   :  { %1022 = vmatpush3.msra.mxu0 %v91_v13 }
  0x37   :  { %1023 = vmatprep.subr.mxu0 %v90_v14 }
  0x38   :  { %1024 = vmatpush3.msra.mxu0 %v90_v14  ;;  %v1288_v14 = vld [vmem:[%s1709_s2] ss:$0 sm:$0xff] }
  0x39   :  { %1025 = vmatprep.subr.mxu0 %v89_v15 }
  0x3a   :  { %1026 = vmatpush3.msra.mxu0 %v89_v15 }
  0x3b   :  { %1027 = vmatprep.subr.mxu0 %v88_v16 }
  0x3c   :  { %1028 = vmatpush3.msra.mxu0 %v88_v16 }
  0x3d   :  { %1030 = vmatmul.mubr.f32.vlgmr.msra.gmra.mxu0 %v57_v17 }
  0x3e   :  { %1032 = vmatprep.mubr.f32.mxu0 %v58_v18 }
  0x41   :  { %1033 = vmatmul.mubr.f32.gmra.mxu0 %v59_v19 }
  0x42   :  { %1035 = vmatprep.mubr.f32.mxu0 %v60_v20 }
  0x45   :  { %1036 = vmatmul.mubr.f32.gmra.mxu0 %v61_v21 }
  0x46   :  { %1038 = vmatprep.mubr.f32.mxu0 %v62_v22 }
  0x49   :  { %1039 = vmatmul.mubr.f32.gmra.mxu0 %v63_v23 }
  0x4a   :  { %1041 = vmatprep.mubr.f32.mxu0 %v64_v24 }
  0x4d   :  { %1042 = vmatmul.mubr.f32.gmra.mxu0 %v65_v25 }
  0x4e   :  { %1044 = vmatprep.mubr.f32.mxu0 %v66_v26 }
  0x51   :  { %1045 = vmatmul.mubr.f32.gmra.mxu0 %v67_v27 }
  0x52   :  { %1047 = vmatprep.mubr.f32.mxu0 %v68_v28 }
  0x55   :  { %1048 = vmatmul.mubr.f32.gmra.mxu0 %v69_v29 }
  0x56   :  { %1050 = vmatprep.mubr.f32.mxu0 %v70_v30 }
  0x59   :  { %1051 = vmatmul.mubr.f32.gmra.mxu0 %v71_v31 }
  0x5a   :  { %1053 = vmatprep.mubr.f32.mxu0 %v72_v32 }
  0x5d   :  { %1054 = vmatmul.mubr.f32.gmra.mxu0 %v73_v33 }
  0x5e   :  { %1056 = vmatprep.mubr.f32.mxu0 %v74_v34 }
  0x61   :  { %1057 = vmatmul.mubr.f32.gmra.mxu0 %v75_v35 }
  0x62   :  { %1059 = vmatprep.mubr.f32.mxu0 %v76_v36 }
  0x65   :  { %1060 = vmatmul.mubr.f32.gmra.mxu0 %v77_v37 }
  0x66   :  { %1062 = vmatprep.mubr.f32.mxu0 %v78_v38 }
  0x69   :  { %1063 = vmatmul.mubr.f32.gmra.mxu0 %v79_v39 }
  0x6a   :  { %1065 = vmatprep.mubr.f32.mxu0 %v80_v40 }
  0x6d   :  { %1066 = vmatmul.mubr.f32.gmra.mxu0 %v81_v41 }
  0x6e   :  { %1068 = vmatprep.mubr.f32.mxu0 %v82_v42 }
  0x71   :  { %1069 = vmatmul.mubr.f32.gmra.mxu0 %v83_v43 }
  0x72   :  { %1071 = vmatprep.mubr.f32.mxu0 %v84_v44 }
  0x75   :  { %1072 = vmatmul.mubr.f32.gmra.mxu0 %v85_v45 }
  0x76   :  { %1074 = vmatprep.mubr.f32.mxu0 %v86_v46 }
  0x79   :  { %1075 = vmatmul.mubr.f32.gmra.mxu0 %v87_v47 }
  0xfd   :  { %v1265_v48 = vpop.f32.mrf.mxu0 }
  0xfe   :  { %v1414_v46 = vadd.f32 %v1265_v48, %v1288_v14 }
  0xff   :  { %v1267_v49 = vpop.f32.mrf.mxu0 }
 0x101   :  { %v1269_v50 = vpop.f32.mrf.mxu0 }
 0x102   :  { %v1394_v42 = vadd.f32 %v1269_v50, %v1288_v14  ;;  %v1424_v50 = vadd.f32 %v1288_v14, %v1267_v49 }
 0x103   :  { %v1271_v51 = vpop.f32.mrf.mxu0 }
 0x104   :  { %v1404_v44 = vadd.f32 %v1288_v14, %v1271_v51 }
 0x105   :  { %v1273_v52 = vpop.f32.mrf.mxu0 }
 0x106   :  { %v1376_v38 = vadd.f32 %v1273_v52, %v1288_v14 }
 0x107   :  { %v1275_v53 = vpop.f32.mrf.mxu0 }
 0x108   :  { %v1385_v40 = vadd.f32 %v1288_v14, %v1275_v53 }
 0x109   :  { %v1040_v54 = vpop.f32.mrf.mxu0 }
 0x10a   :  { %v1358_v34 = vadd.f32 %v1040_v54, %v1288_v14 }
 0x10b   :  { %v1277_v55 = vpop.f32.mrf.mxu0 }
 0x10c   :  { %v1367_v36 = vadd.f32 %v1288_v14, %v1277_v55 }
 0x10d   :  { %v1043_v56 = vpop.f32.mrf.mxu0 }
 0x10e   :  { %v1342_v30 = vadd.f32 %v1043_v56, %v1288_v14 }
 0x10f   :  { %v217_v57 = vpop.f32.mrf.mxu0 }
 0x110   :  { %v1350_v32 = vadd.f32 %v1288_v14, %v217_v57 }
 0x111   :  { %v1046_v58 = vpop.f32.mrf.mxu0 }
 0x112   :  { %v1326_v26 = vadd.f32 %v1046_v58, %v1288_v14 }
 0x113   :  { %v227_v59 = vpop.f32.mrf.mxu0 }
 0x114   :  { %v1334_v28 = vadd.f32 %v1288_v14, %v227_v59 }
 0x115   :  { %v1049_v60 = vpop.f32.mrf.mxu0 }
 0x116   :  { %v1310_v22 = vadd.f32 %v1049_v60, %v1288_v14 }
 0x117   :  { %v237_v61 = vpop.f32.mrf.mxu0 }
 0x118   :  { %v1318_v24 = vadd.f32 %v1288_v14, %v237_v61 }
 0x119   :  { %v1052_v62 = vpop.f32.mrf.mxu0 }
 0x11a   :  { %v1298_v19 = vadd.f32 %v1052_v62, %v1288_v14 }
 0x11b   :  { %v247_v63 = vpop.f32.mrf.mxu0 }
 0x11c   :  { %v1302_v20 = vadd.f32 %v1288_v14, %v247_v63 }
 0x11d   :  { %v1279_v0 = vpop.f32.mrf.mxu0 }
 0x11e   :  { %v1409_v45 = vadd.f32 %v1279_v0, %v1288_v14 }
 0x11f   :  { %v1281_v1 = vpop.f32.mrf.mxu0 }
 0x120   :  { %v1419_v47 = vadd.f32 %v1288_v14, %v1281_v1 }
 0x121   :  { %v1058_v2 = vpop.f32.mrf.mxu0 }
 0x122   :  { %v1389_v41 = vadd.f32 %v1058_v2, %v1288_v14 }
 0x123   :  { %v1283_v3 = vpop.f32.mrf.mxu0 }
 0x124   :  { %v1399_v43 = vadd.f32 %v1288_v14, %v1283_v3 }
 0x125   :  { %v1061_v4 = vpop.f32.mrf.mxu0 }
 0x126   :  { %v1371_v37 = vadd.f32 %v1061_v4, %v1288_v14 }
 0x127   :  { %v277_v5 = vpop.f32.mrf.mxu0 }
 0x128   :  { %v1380_v39 = vadd.f32 %v1288_v14, %v277_v5 }
 0x129   :  { %v1064_v6 = vpop.f32.mrf.mxu0 }
 0x12a   :  { %v1354_v33 = vadd.f32 %v1064_v6, %v1288_v14 }
 0x12b   :  { %v287_v7 = vpop.f32.mrf.mxu0 }
 0x12c   :  { %v1362_v35 = vadd.f32 %v1288_v14, %v287_v7 }
 0x12d   :  { %v1067_v8 = vpop.f32.mrf.mxu0 }
 0x12e   :  { %v1338_v29 = vadd.f32 %v1067_v8, %v1288_v14 }
 0x12f   :  { %v297_v9 = vpop.f32.mrf.mxu0 }
 0x130   :  { %v1346_v31 = vadd.f32 %v1288_v14, %v297_v9 }
 0x131   :  { %v1070_v10 = vpop.f32.mrf.mxu0 }
 0x132   :  { %v1322_v25 = vadd.f32 %v1070_v10, %v1288_v14 }
 0x133   :  { %v307_v11 = vpop.f32.mrf.mxu0 }
 0x134   :  { %v1330_v27 = vadd.f32 %v1288_v14, %v307_v11 }
 0x135   :  { %v1073_v12 = vpop.f32.mrf.mxu0 }
 0x136   :  { %v1306_v21 = vadd.f32 %v1073_v12, %v1288_v14 }
 0x137   :  { %v317_v13 = vpop.f32.mrf.mxu0 }
 0x138   :  { %v1314_v23 = vadd.f32 %v1288_v14, %v317_v13 }
 0x139   :  { %v1076_v15 = vpop.f32.mrf.mxu0 }
 0x13a   :  { %v1291_v16 = vadd.f32 %v1076_v15, %v1288_v14 }
 0x13b   :  { %v327_v17 = vpop.f32.mrf.mxu0 }
 0x13c   :  { %v1294_v18 = vadd.f32 %v1288_v14, %v327_v17  ;;  %398 = vadd.xlane.f32.xlu0 %v1291_v16 }
 0x13e   :  { %396 = vadd.xlane.f32.xlu1 %v1294_v18 }
 0x140   :  { %366 = vadd.xlane.f32.xlu0 %v1298_v19 }
 0x142   :  { %364 = vadd.xlane.f32.xlu1 %v1302_v20 }
 0x144   :  { %394 = vadd.xlane.f32.xlu0 %v1306_v21 }
 0x146   :  { %362 = vadd.xlane.f32.xlu1 %v1310_v22 }
 0x148   :  { %392 = vadd.xlane.f32.xlu0 %v1314_v23 }
 0x14a   :  { %360 = vadd.xlane.f32.xlu1 %v1318_v24 }
 0x14c   :  { %390 = vadd.xlane.f32.xlu0 %v1322_v25 }
 0x14e   :  { %358 = vadd.xlane.f32.xlu1 %v1326_v26 }
 0x150   :  { %388 = vadd.xlane.f32.xlu0 %v1330_v27 }
 0x152   :  { %356 = vadd.xlane.f32.xlu1 %v1334_v28 }
 0x154   :  { %386 = vadd.xlane.f32.xlu0 %v1338_v29 }
 0x156   :  { %354 = vadd.xlane.f32.xlu1 %v1342_v30 }
 0x158   :  { %384 = vadd.xlane.f32.xlu0 %v1346_v31 }
 0x15a   :  { %352 = vadd.xlane.f32.xlu1 %v1350_v32 }
 0x15c   :  { %382 = vadd.xlane.f32.xlu0 %v1354_v33 }
 0x15e   :  { %350 = vadd.xlane.f32.xlu1 %v1358_v34 }
 0x160   :  { %380 = vadd.xlane.f32.xlu0 %v1362_v35 }
 0x162   :  { %348 = vadd.xlane.f32.xlu1 %v1367_v36 }
 0x164   :  { %378 = vadd.xlane.f32.xlu0 %v1371_v37 }
 0x166   :  { %346 = vadd.xlane.f32.xlu1 %v1376_v38 }
 0x168   :  { %376 = vadd.xlane.f32.xlu0 %v1380_v39 }
 0x16a   :  { %344 = vadd.xlane.f32.xlu1 %v1385_v40 }
 0x16c   :  { %374 = vadd.xlane.f32.xlu0 %v1389_v41 }
 0x16e   :  { %342 = vadd.xlane.f32.xlu1 %v1394_v42 }
 0x170   :  { %372 = vadd.xlane.f32.xlu0 %v1399_v43 }
 0x172   :  { %340 = vadd.xlane.f32.xlu1 %v1404_v44 }
 0x174   :  { %370 = vadd.xlane.f32.xlu0 %v1409_v45 }
 0x176   :  { %338 = vadd.xlane.f32.xlu1 %v1414_v46 }
 0x178   :  { %368 = vadd.xlane.f32.xlu0 %v1419_v47 }
 0x17a   :  { %336 = vadd.xlane.f32.xlu1 %v1424_v50 }
 0x1c5   :  { %v399_v51 = vpop.xlane.xlu0 %398 }
 0x1c6   :  { %v432_v52 = vmul.f32 0.0078125, %v399_v51 }
 0x1c7   :  { %v397_v48 = vpop.xlane.xlu1 %396 }
 0x1c8   :  { %v1429_v53 = vsub.f32 %v1291_v16, %v432_v52  ;;  %v431_v54 = vmul.f32 0.0078125, %v397_v48 }
 0x1c9   :  { %v367_v55 = vpop.xlane.xlu0 %366 }
 0x1ca   :  { %v1432_v56 = vsub.f32 %v1294_v18, %v431_v54  ;;  %v416_v57 = vmul.f32 0.0078125, %v367_v55  ;;  %v496_v49 = vmul.f32 %v1429_v53, %v1429_v53 }
 0x1cb   :  { %v365_v58 = vpop.xlane.xlu1 %364 }
 0x1cc   :  { %v1437_v59 = vsub.f32 %v1298_v19, %v416_v57  ;;  %v415_v60 = vmul.f32 0.0078125, %v365_v58  ;;  %559 = vadd.xlane.f32.xlu0 %v496_v49  ;;  %v495_v0 = vmul.f32 %v1432_v56, %v1432_v56 }
 0x1cd   :  { %v395_v61 = vpop.xlane.xlu0 %394 }
 0x1ce   :  { %v1440_v62 = vsub.f32 %v1302_v20, %v415_v60  ;;  %v430_v63 = vmul.f32 0.0078125, %v395_v61  ;;  %v480_v1 = vmul.f32 %v1437_v59, %v1437_v59 }
 0x1cf   :  { %v363_v2 = vpop.xlane.xlu1 %362 }
 0x1d0   :  { %v1447_v3 = vsub.f32 %v1306_v21, %v430_v63  ;;  %v414_v4 = vmul.f32 0.0078125, %v363_v2  ;;  %557 = vadd.xlane.f32.xlu0 %v495_v0  ;;  %527 = vadd.xlane.f32.xlu1 %v480_v1  ;;  %v479_v9 = vmul.f32 %v1440_v62, %v1440_v62 }
 0x1d1   :  { %v393_v5 = vpop.xlane.xlu0 %392 }
 0x1d2   :  { %v1450_v6 = vsub.f32 %v1310_v22, %v414_v4  ;;  %v429_v7 = vmul.f32 0.0078125, %v393_v5  ;;  %v494_v8 = vmul.f32 %v1447_v3, %v1447_v3 }
 0x1d3   :  { %v361_v10 = vpop.xlane.xlu1 %360 }
 0x1d4   :  { %v1457_v11 = vsub.f32 %v1314_v23, %v429_v7  ;;  %v413_v12 = vmul.f32 0.0078125, %v361_v10  ;;  %555 = vadd.xlane.f32.xlu0 %v494_v8  ;;  %525 = vadd.xlane.f32.xlu1 %v479_v9  ;;  %v478_v17 = vmul.f32 %v1450_v6, %v1450_v6 }
 0x1d5   :  { %v391_v13 = vpop.xlane.xlu0 %390 }
 0x1d6   :  { %v1460_v14 = vsub.f32 %v1318_v24, %v413_v12  ;;  %v428_v15 = vmul.f32 0.0078125, %v391_v13  ;;  %v493_v16 = vmul.f32 %v1457_v11, %v1457_v11 }
 0x1d7   :  { %v359_v18 = vpop.xlane.xlu1 %358 }
 0x1d8   :  { %v1467_v19 = vsub.f32 %v1322_v25, %v428_v15  ;;  %v412_v20 = vmul.f32 0.0078125, %v359_v18  ;;  %553 = vadd.xlane.f32.xlu0 %v493_v16  ;;  %523 = vadd.xlane.f32.xlu1 %v478_v17  ;;  %v477_v51 = vmul.f32 %v1460_v14, %v1460_v14 }
 0x1d9   :  { %v389_v21 = vpop.xlane.xlu0 %388 }
 0x1da   :  { %v1470_v22 = vsub.f32 %v1326_v26, %v412_v20  ;;  %v427_v23 = vmul.f32 0.0078125, %v389_v21  ;;  %v492_v24 = vmul.f32 %v1467_v19, %v1467_v19 }
 0x1db   :  { %v357_v52 = vpop.xlane.xlu1 %356 }
 0x1dc   :  { %v1477_v48 = vsub.f32 %v1330_v27, %v427_v23  ;;  %v411_v25 = vmul.f32 0.0078125, %v357_v52  ;;  %551 = vadd.xlane.f32.xlu0 %v492_v24  ;;  %521 = vadd.xlane.f32.xlu1 %v477_v51  ;;  %v476_v49 = vmul.f32 %v1470_v22, %v1470_v22 }
 0x1dd   :  { %v387_v54 = vpop.xlane.xlu0 %386 }
 0x1de   :  { %v1480_v55 = vsub.f32 %v1334_v28, %v411_v25  ;;  %v426_v26 = vmul.f32 0.0078125, %v387_v54  ;;  %v491_v57 = vmul.f32 %v1477_v48, %v1477_v48 }
 0x1df   :  { %v355_v58 = vpop.xlane.xlu1 %354 }
 0x1e0   :  { %v1487_v60 = vsub.f32 %v1338_v29, %v426_v26  ;;  %v410_v27 = vmul.f32 0.0078125, %v355_v58  ;;  %549 = vadd.xlane.f32.xlu0 %v491_v57  ;;  %519 = vadd.xlane.f32.xlu1 %v476_v49  ;;  %v475_v1 = vmul.f32 %v1480_v55, %v1480_v55 }
 0x1e1   :  { %v385_v61 = vpop.xlane.xlu0 %384 }
 0x1e2   :  { %v1490_v63 = vsub.f32 %v1342_v30, %v410_v27  ;;  %v425_v28 = vmul.f32 0.0078125, %v385_v61  ;;  %v490_v0 = vmul.f32 %v1487_v60, %v1487_v60 }
 0x1e3   :  { %v353_v2 = vpop.xlane.xlu1 %352 }
 0x1e4   :  { %v1497_v4 = vsub.f32 %v1346_v31, %v425_v28  ;;  %v409_v29 = vmul.f32 0.0078125, %v353_v2  ;;  %547 = vadd.xlane.f32.xlu0 %v490_v0  ;;  %517 = vadd.xlane.f32.xlu1 %v475_v1  ;;  %v474_v9 = vmul.f32 %v1490_v63, %v1490_v63 }
 0x1e5   :  { %v383_v5 = vpop.xlane.xlu0 %382 }
 0x1e6   :  { %v1500_v7 = vsub.f32 %v1350_v32, %v409_v29  ;;  %v424_v30 = vmul.f32 0.0078125, %v383_v5  ;;  %v489_v8 = vmul.f32 %v1497_v4, %v1497_v4 }
 0x1e7   :  { %v351_v10 = vpop.xlane.xlu1 %350 }
 0x1e8   :  { %v1507_v12 = vsub.f32 %v1354_v33, %v424_v30  ;;  %v408_v31 = vmul.f32 0.0078125, %v351_v10  ;;  %545 = vadd.xlane.f32.xlu0 %v489_v8  ;;  %515 = vadd.xlane.f32.xlu1 %v474_v9  ;;  %v473_v17 = vmul.f32 %v1500_v7, %v1500_v7 }
 0x1e9   :  { %v381_v13 = vpop.xlane.xlu0 %380 }
 0x1ea   :  { %v1510_v15 = vsub.f32 %v1358_v34, %v408_v31  ;;  %v423_v32 = vmul.f32 0.0078125, %v381_v13  ;;  %v488_v16 = vmul.f32 %v1507_v12, %v1507_v12 }
 0x1eb   :  { %v349_v18 = vpop.xlane.xlu1 %348 }
 0x1ec   :  { %v1517_v20 = vsub.f32 %v1362_v35, %v423_v32  ;;  %v407_v33 = vmul.f32 0.0078125, %v349_v18  ;;  %543 = vadd.xlane.f32.xlu0 %v488_v16  ;;  %513 = vadd.xlane.f32.xlu1 %v473_v17  ;;  %v472_v51 = vmul.f32 %v1510_v15, %v1510_v15 }
 0x1ed   :  { %v379_v21 = vpop.xlane.xlu0 %378 }
 0x1ee   :  { %v1520_v23 = vsub.f32 %v1367_v36, %v407_v33  ;;  %v422_v34 = vmul.f32 0.0078125, %v379_v21  ;;  %v487_v24 = vmul.f32 %v1517_v20, %v1517_v20 }
 0x1ef   :  { %v347_v52 = vpop.xlane.xlu1 %346 }
 0x1f0   :  { %v1527_v25 = vsub.f32 %v1371_v37, %v422_v34  ;;  %v406_v35 = vmul.f32 0.0078125, %v347_v52  ;;  %541 = vadd.xlane.f32.xlu0 %v487_v24  ;;  %511 = vadd.xlane.f32.xlu1 %v472_v51  ;;  %v471_v49 = vmul.f32 %v1520_v23, %v1520_v23 }
 0x1f1   :  { %v377_v54 = vpop.xlane.xlu0 %376 }
 0x1f2   :  { %v1530_v26 = vsub.f32 %v1376_v38, %v406_v35  ;;  %v421_v36 = vmul.f32 0.0078125, %v377_v54  ;;  %v486_v57 = vmul.f32 %v1527_v25, %v1527_v25 }
 0x1f3   :  { %v345_v58 = vpop.xlane.xlu1 %344 }
 0x1f4   :  { %v1537_v27 = vsub.f32 %v1380_v39, %v421_v36  ;;  %v405_v37 = vmul.f32 0.0078125, %v345_v58  ;;  %539 = vadd.xlane.f32.xlu0 %v486_v57  ;;  %509 = vadd.xlane.f32.xlu1 %v471_v49  ;;  %v470_v1 = vmul.f32 %v1530_v26, %v1530_v26 }
 0x1f5   :  { %v375_v61 = vpop.xlane.xlu0 %374 }
 0x1f6   :  { %v1540_v28 = vsub.f32 %v1385_v40, %v405_v37  ;;  %v420_v38 = vmul.f32 0.0078125, %v375_v61  ;;  %v485_v0 = vmul.f32 %v1537_v27, %v1537_v27 }
 0x1f7   :  { %v343_v2 = vpop.xlane.xlu1 %342 }
 0x1f8   :  { %v1547_v29 = vsub.f32 %v1389_v41, %v420_v38  ;;  %v404_v39 = vmul.f32 0.0078125, %v343_v2  ;;  %537 = vadd.xlane.f32.xlu0 %v485_v0  ;;  %507 = vadd.xlane.f32.xlu1 %v470_v1  ;;  %v469_v9 = vmul.f32 %v1540_v28, %v1540_v28 }
 0x1f9   :  { %v373_v5 = vpop.xlane.xlu0 %372 }
 0x1fa   :  { %v1550_v30 = vsub.f32 %v1394_v42, %v404_v39  ;;  %v419_v40 = vmul.f32 0.0078125, %v373_v5  ;;  %v484_v8 = vmul.f32 %v1547_v29, %v1547_v29 }
 0x1fb   :  { %v341_v10 = vpop.xlane.xlu1 %340 }
 0x1fc   :  { %v1557_v31 = vsub.f32 %v1399_v43, %v419_v40  ;;  %v403_v41 = vmul.f32 0.0078125, %v341_v10  ;;  %535 = vadd.xlane.f32.xlu0 %v484_v8  ;;  %505 = vadd.xlane.f32.xlu1 %v469_v9  ;;  %v468_v17 = vmul.f32 %v1550_v30, %v1550_v30 }
 0x1fd   :  { %v371_v13 = vpop.xlane.xlu0 %370 }
 0x1fe   :  { %v1560_v32 = vsub.f32 %v1404_v44, %v403_v41  ;;  %v418_v42 = vmul.f32 0.0078125, %v371_v13  ;;  %v483_v16 = vmul.f32 %v1557_v31, %v1557_v31 }
 0x1ff   :  { %v339_v18 = vpop.xlane.xlu1 %338 }
 0x200   :  { %v1567_v33 = vsub.f32 %v1409_v45, %v418_v42  ;;  %v402_v43 = vmul.f32 0.0078125, %v339_v18  ;;  %533 = vadd.xlane.f32.xlu0 %v483_v16  ;;  %503 = vadd.xlane.f32.xlu1 %v468_v17  ;;  %v467_v51 = vmul.f32 %v1560_v32, %v1560_v32 }
 0x201   :  { %v369_v21 = vpop.xlane.xlu0 %368 }
 0x202   :  { %v1570_v34 = vsub.f32 %v1414_v46, %v402_v43  ;;  %v417_v44 = vmul.f32 0.0078125, %v369_v21  ;;  %v482_v24 = vmul.f32 %v1567_v33, %v1567_v33 }
 0x203   :  { %v337_v52 = vpop.xlane.xlu1 %336 }
 0x204   :  { %v1577_v35 = vsub.f32 %v1419_v47, %v417_v44  ;;  %v401_v45 = vmul.f32 0.0078125, %v337_v52  ;;  %531 = vadd.xlane.f32.xlu0 %v482_v24  ;;  %501 = vadd.xlane.f32.xlu1 %v467_v51  ;;  %v466_v36 = vmul.f32 %v1570_v34, %v1570_v34  ;;  %v1591_v47 = vld [vmem:[%s1712_s5] sm:$0x1] }
 0x205   :  { %995 = vmatprep.mubr.f32.mxu1 %v1591_v47  ;;  %v1597_v52 = vld [vmem:[%s1710_s3] ss:$0 sm:$0xff] }
 0x206   :  { %v1580_v54 = vsub.f32 %v1424_v50, %v401_v45  ;;  %v481_v46 = vmul.f32 %v1577_v35, %v1577_v35 }
 0x208   :  { %529 = vadd.xlane.f32.xlu0 %v481_v46  ;;  %499 = vadd.xlane.f32.xlu1 %v466_v36  ;;  %v465_v57 = vmul.f32 %v1580_v54, %v1580_v54 }
 0x20c   :  { %497 = vadd.xlane.f32.xlu1 %v465_v57 }
 0x255   :  { %v560_v50 = vpop.xlane.xlu0 %559 }
 0x256   :  { %v592_v49 = vmul.f32 0.0078125, %v560_v50 }
 0x258   :  { %v624_v58 = vadd.f32 1e-05, %v592_v49  ;;  %v1603_v49 = vld [vmem:[%s1711_s4] ss:$0 sm:$0xff] }
 0x259   :  { %v558_v37 = vpop.xlane.xlu0 %557  ;;  %v528_v61 = vpop.xlane.xlu1 %527 }
 0x25a   :  { %1083 = vrsqrt.f32 %v624_v58  ;;  %v591_v38 = vmul.f32 0.0078125, %v558_v37  ;;  %v576_v0 = vmul.f32 0.0078125, %v528_v61 }
 0x25c   :  { %v623_v1 = vadd.f32 1e-05, %v591_v38  ;;  %v608_v2 = vadd.f32 1e-05, %v576_v0 }
 0x25d   :  { %v556_v39 = vpop.xlane.xlu0 %555  ;;  %v526_v5 = vpop.xlane.xlu1 %525 }
 0x25e   :  { %1085 = vrsqrt.f32 %v623_v1  ;;  %v590_v40 = vmul.f32 0.0078125, %v556_v39  ;;  %v575_v8 = vmul.f32 0.0078125, %v526_v5 }
 0x25f   :  { %1087 = vrsqrt.f32 %v608_v2 }
 0x260   :  { %v622_v9 = vadd.f32 1e-05, %v590_v40  ;;  %v607_v10 = vadd.f32 1e-05, %v575_v8 }
 0x261   :  { %v554_v41 = vpop.xlane.xlu0 %553  ;;  %v524_v13 = vpop.xlane.xlu1 %523 }
 0x262   :  { %1089 = vrsqrt.f32 %v622_v9  ;;  %v589_v42 = vmul.f32 0.0078125, %v554_v41  ;;  %v574_v16 = vmul.f32 0.0078125, %v524_v13 }
 0x263   :  { %1091 = vrsqrt.f32 %v607_v10 }
 0x264   :  { %v621_v17 = vadd.f32 1e-05, %v589_v42  ;;  %v606_v18 = vadd.f32 1e-05, %v574_v16 }
 0x265   :  { %v552_v43 = vpop.xlane.xlu0 %551  ;;  %v522_v21 = vpop.xlane.xlu1 %521 }
 0x266   :  { %1093 = vrsqrt.f32 %v621_v17  ;;  %v588_v44 = vmul.f32 0.0078125, %v552_v43  ;;  %v573_v24 = vmul.f32 0.0078125, %v522_v21 }
 0x267   :  { %v1084_v51 = vpop.eup %1083  ;;  %1095 = vrsqrt.f32 %v606_v18 }
 0x268   :  { %v620_v45 = vadd.f32 1e-05, %v588_v44  ;;  %v605_v46 = vadd.f32 1e-05, %v573_v24  ;;  %v688_v36 = vmul.f32 %v1084_v51, %v1429_v53 }
 0x269   :  { %v550_v57 = vpop.xlane.xlu0 %549  ;;  %v520_v50 = vpop.xlane.xlu1 %519 }
 0x26a   :  { %1097 = vrsqrt.f32 %v620_v45  ;;  %v587_v58 = vmul.f32 0.0078125, %v550_v57  ;;  %v572_v37 = vmul.f32 0.0078125, %v520_v50  ;;  %v727_v61 = vmul.f32 %v1597_v52, %v688_v36 }
 0x26b   :  { %v1086_v38 = vpop.eup %1085  ;;  %1099 = vrsqrt.f32 %v605_v46 }
 0x26c   :  { %v1088_v0 = vpop.eup %1087  ;;  %v619_v1 = vadd.f32 1e-05, %v587_v58  ;;  %v604_v2 = vadd.f32 1e-05, %v572_v37  ;;  %v766_v39 = vadd.f32 %v1603_v49, %v727_v61  ;;  %v687_v53 = vmul.f32 %v1086_v38, %v1432_v56 }
 0x26d   :  { %v548_v5 = vpop.xlane.xlu0 %547  ;;  %v518_v40 = vpop.xlane.xlu1 %517  ;;  %v672_v8 = vmul.f32 %v1088_v0, %v1437_v59 }
 0x26e   :  { %1101 = vrsqrt.f32 %v619_v1  ;;  %v586_v9 = vmul.f32 0.0078125, %v548_v5  ;;  %v571_v10 = vmul.f32 0.0078125, %v518_v40  ;;  %v798_v41 = vmax.f32 %v766_v39, 0.0 }
 0x26f   :  { %v1090_v13 = vpop.eup %1089  ;;  %1103 = vrsqrt.f32 %v604_v2  ;;  %v711_v42 = vmul.f32 %v1597_v52, %v672_v8  ;;  %v726_v16 = vmul.f32 %v1597_v52, %v687_v53 }
 0x270   :  { %v1092_v17 = vpop.eup %1091  ;;  %v618_v18 = vadd.f32 1e-05, %v586_v9  ;;  %v603_v43 = vadd.f32 1e-05, %v571_v10  ;;  %963 = vmatprep.subr.mxu1 %v798_v41  ;;  %v686_v56 = vmul.f32 %v1090_v13, %v1447_v3 }
 0x271   :  { %v546_v21 = vpop.xlane.xlu0 %545  ;;  %v516_v44 = vpop.xlane.xlu1 %515  ;;  %v750_v59 = vadd.f32 %v1603_v49, %v711_v42  ;;  %v765_v24 = vadd.f32 %v1603_v49, %v726_v16  ;;  %v671_v51 = vmul.f32 %v1092_v17, %v1440_v62 }
 0x272   :  { %1105 = vrsqrt.f32 %v618_v18  ;;  %v585_v45 = vmul.f32 0.0078125, %v546_v21  ;;  %v570_v46 = vmul.f32 0.0078125, %v516_v44  ;;  %v725_v36 = vmul.f32 %v1597_v52, %v686_v56 }
 0x273   :  { %v1094_v57 = vpop.eup %1093  ;;  %1107 = vrsqrt.f32 %v603_v43  ;;  %v782_v50 = vmax.f32 %v750_v59, 0.0  ;;  %v797_v58 = vmax.f32 %v765_v24, 0.0  ;;  %v710_v37 = vmul.f32 %v1597_v52, %v671_v51 }
 0x274   :  { %v1096_v3 = vpop.eup %1095  ;;  %v617_v61 = vadd.f32 1e-05, %v585_v45  ;;  %v602_v38 = vadd.f32 1e-05, %v570_v46  ;;  %v764_v0 = vadd.f32 %v1603_v49, %v725_v36  ;;  %v685_v1 = vmul.f32 %v1094_v57, %v1457_v11 }
 0x275   :  { %964 = vmatpush3.xpose.msra.mxu1 %v782_v50  ;;  %v544_v62 = vpop.xlane.xlu0 %543  ;;  %v514_v2 = vpop.xlane.xlu1 %513  ;;  %v749_v39 = vadd.f32 %v1603_v49, %v710_v37  ;;  %v670_v53 = vmul.f32 %v1096_v3, %v1450_v6 }
 0x276   :  { %1109 = vrsqrt.f32 %v617_v61  ;;  %v584_v5 = vmul.f32 0.0078125, %v544_v62  ;;  %965 = vmatprep.subr.mxu1 %v797_v58  ;;  %v569_v40 = vmul.f32 0.0078125, %v514_v2  ;;  %v796_v8 = vmax.f32 %v764_v0, 0.0 }
 0x277   :  { %v1098_v9 = vpop.eup %1097  ;;  %1111 = vrsqrt.f32 %v602_v38  ;;  %v781_v10 = vmax.f32 %v749_v39, 0.0  ;;  %v709_v41 = vmul.f32 %v1597_v52, %v670_v53  ;;  %v724_v13 = vmul.f32 %v1597_v52, %v685_v1 }
 0x278   :  { %v1100_v11 = vpop.eup %1099  ;;  %v616_v42 = vadd.f32 1e-05, %v584_v5  ;;  %v601_v16 = vadd.f32 1e-05, %v569_v40  ;;  %v684_v17 = vmul.f32 %v1098_v9, %v1467_v19 }
 0x279   :  { %966 = vmatpush3.xpose.msra.mxu1 %v781_v10  ;;  %v542_v18 = vpop.xlane.xlu0 %541  ;;  %v512_v6 = vpop.xlane.xlu1 %511  ;;  %v748_v43 = vadd.f32 %v1603_v49, %v709_v41  ;;  %v763_v56 = vadd.f32 %v1603_v49, %v724_v13  ;;  %v669_v21 = vmul.f32 %v1100_v11, %v1460_v14 }
 0x27a   :  { %1113 = vrsqrt.f32 %v616_v42  ;;  %v583_v44 = vmul.f32 0.0078125, %v542_v18  ;;  %967 = vmatprep.subr.mxu1 %v796_v8  ;;  %v568_v59 = vmul.f32 0.0078125, %v512_v6  ;;  %v723_v24 = vmul.f32 %v1597_v52, %v684_v17 }
 0x27b   :  { %v1102_v51 = vpop.eup %1101  ;;  %1115 = vrsqrt.f32 %v601_v16  ;;  %v780_v45 = vmax.f32 %v748_v43, 0.0  ;;  %v795_v46 = vmax.f32 %v763_v56, 0.0  ;;  %v708_v19 = vmul.f32 %v1597_v52, %v669_v21 }
 0x27c   :  { %v1104_v36 = vpop.eup %1103  ;;  %v615_v57 = vadd.f32 1e-05, %v583_v44  ;;  %v600_v50 = vadd.f32 1e-05, %v568_v59  ;;  %v762_v58 = vadd.f32 %v1603_v49, %v723_v24  ;;  %v683_v37 = vmul.f32 %v1102_v51, %v1477_v48 }
 0x27d   :  { %968 = vmatpush3.xpose.msra.mxu1 %v780_v45  ;;  %v540_v14 = vpop.xlane.xlu0 %539  ;;  %v510_v3 = vpop.xlane.xlu1 %509  ;;  %v747_v61 = vadd.f32 %v1603_v49, %v708_v19  ;;  %v668_v38 = vmul.f32 %v1104_v36, %v1470_v22 }
 0x27e   :  { %1117 = vrsqrt.f32 %v615_v57  ;;  %v582_v0 = vmul.f32 0.0078125, %v540_v14  ;;  %969 = vmatprep.subr.mxu1 %v795_v46  ;;  %v567_v1 = vmul.f32 0.0078125, %v510_v3  ;;  %v794_v62 = vmax.f32 %v762_v58, 0.0 }
 0x27f   :  { %v1106_v2 = vpop.eup %1105  ;;  %1119 = vrsqrt.f32 %v600_v50  ;;  %v779_v39 = vmax.f32 %v747_v61, 0.0  ;;  %v707_v53 = vmul.f32 %v1597_v52, %v668_v38  ;;  %v722_v5 = vmul.f32 %v1597_v52, %v683_v37 }
 0x280   :  { %v1108_v48 = vpop.eup %1107  ;;  %v614_v40 = vadd.f32 1e-05, %v582_v0  ;;  %v599_v8 = vadd.f32 1e-05, %v567_v1  ;;  %v682_v9 = vmul.f32 %v1106_v2, %v1487_v60 }
 0x281   :  { %970 = vmatpush3.xpose.msra.mxu1 %v779_v39  ;;  %v538_v10 = vpop.xlane.xlu0 %537  ;;  %v508_v22 = vpop.xlane.xlu1 %507  ;;  %v746_v41 = vadd.f32 %v1603_v49, %v707_v53  ;;  %v761_v13 = vadd.f32 %v1603_v49, %v722_v5  ;;  %v667_v11 = vmul.f32 %v1108_v48, %v1480_v55 }
 0x282   :  { %1121 = vrsqrt.f32 %v614_v40  ;;  %v581_v42 = vmul.f32 0.0078125, %v538_v10  ;;  %971 = vmatprep.subr.mxu1 %v794_v62  ;;  %v566_v16 = vmul.f32 0.0078125, %v508_v22  ;;  %v721_v17 = vmul.f32 %v1597_v52, %v682_v9 }
 0x283   :  { %v1110_v18 = vpop.eup %1109  ;;  %1123 = vrsqrt.f32 %v599_v8  ;;  %v778_v6 = vmax.f32 %v746_v41, 0.0  ;;  %v793_v43 = vmax.f32 %v761_v13, 0.0  ;;  %v706_v60 = vmul.f32 %v1597_v52, %v667_v11 }
 0x284   :  { %v1112_v56 = vpop.eup %1111  ;;  %v613_v21 = vadd.f32 1e-05, %v581_v42  ;;  %v598_v44 = vadd.f32 1e-05, %v566_v16  ;;  %v760_v59 = vadd.f32 %v1603_v49, %v721_v17  ;;  %v681_v24 = vmul.f32 %v1110_v18, %v1497_v4 }
 0x285   :  { %972 = vmatpush3.xpose.msra.mxu1 %v778_v6  ;;  %v536_v55 = vpop.xlane.xlu0 %535  ;;  %v506_v51 = vpop.xlane.xlu1 %505  ;;  %v745_v45 = vadd.f32 %v1603_v49, %v706_v60  ;;  %v666_v46 = vmul.f32 %v1112_v56, %v1490_v63 }
 0x286   :  { %1125 = vrsqrt.f32 %v613_v21  ;;  %v580_v19 = vmul.f32 0.0078125, %v536_v55  ;;  %973 = vmatprep.subr.mxu1 %v793_v43  ;;  %v565_v36 = vmul.f32 0.0078125, %v506_v51  ;;  %v792_v57 = vmax.f32 %v760_v59, 0.0 }
 0x287   :  { %v1114_v50 = vpop.eup %1113  ;;  %1127 = vrsqrt.f32 %v598_v44  ;;  %v777_v58 = vmax.f32 %v745_v45, 0.0  ;;  %v705_v37 = vmul.f32 %v1597_v52, %v666_v46  ;;  %v720_v14 = vmul.f32 %v1597_v52, %v681_v24 }
 0x288   :  { %v1116_v4 = vpop.eup %1115  ;;  %v612_v3 = vadd.f32 1e-05, %v580_v19  ;;  %v597_v61 = vadd.f32 1e-05, %v565_v36  ;;  %v680_v38 = vmul.f32 %v1114_v50, %v1507_v12 }
 0x289   :  { %974 = vmatpush3.xpose.msra.mxu1 %v777_v58  ;;  %v534_v0 = vpop.xlane.xlu0 %533  ;;  %v504_v63 = vpop.xlane.xlu1 %503  ;;  %v744_v1 = vadd.f32 %v1603_v49, %v705_v37  ;;  %v759_v62 = vadd.f32 %v1603_v49, %v720_v14  ;;  %v665_v2 = vmul.f32 %v1116_v4, %v1500_v7 }
 0x28a   :  { %1129 = vrsqrt.f32 %v612_v3  ;;  %v579_v39 = vmul.f32 0.0078125, %v534_v0  ;;  %975 = vmatprep.subr.mxu1 %v792_v57  ;;  %v564_v53 = vmul.f32 0.0078125, %v504_v63  ;;  %v719_v5 = vmul.f32 %v1597_v52, %v680_v38 }
 0x28b   :  { %v1118_v48 = vpop.eup %1117  ;;  %1131 = vrsqrt.f32 %v597_v61  ;;  %v776_v40 = vmax.f32 %v744_v1, 0.0  ;;  %v791_v8 = vmax.f32 %v759_v62, 0.0  ;;  %v704_v12 = vmul.f32 %v1597_v52, %v665_v2 }
 0x28c   :  { %v1120_v9 = vpop.eup %1119  ;;  %v611_v10 = vadd.f32 1e-05, %v579_v39  ;;  %v596_v22 = vadd.f32 1e-05, %v564_v53  ;;  %v758_v41 = vadd.f32 %v1603_v49, %v719_v5  ;;  %v679_v13 = vmul.f32 %v1118_v48, %v1517_v20 }
 0x28d   :  { %976 = vmatpush3.xpose.msra.mxu1 %v776_v40  ;;  %v532_v7 = vpop.xlane.xlu0 %531  ;;  %v502_v11 = vpop.xlane.xlu1 %501  ;;  %v743_v42 = vadd.f32 %v1603_v49, %v704_v12  ;;  %v664_v16 = vmul.f32 %v1120_v9, %v1510_v15 }
 0x28e   :  { %1133 = vrsqrt.f32 %v611_v10  ;;  %v578_v17 = vmul.f32 0.0078125, %v532_v7  ;;  %977 = vmatprep.subr.mxu1 %v791_v8  ;;  %v563_v18 = vmul.f32 0.0078125, %v502_v11  ;;  %v790_v6 = vmax.f32 %v758_v41, 0.0 }
 0x28f   :  { %v1122_v43 = vpop.eup %1121  ;;  %1135 = vrsqrt.f32 %v596_v22  ;;  %v775_v60 = vmax.f32 %v743_v42, 0.0  ;;  %v703_v56 = vmul.f32 %v1597_v52, %v664_v16  ;;  %v718_v21 = vmul.f32 %v1597_v52, %v679_v13 }
 0x290   :  { %v1124_v20 = vpop.eup %1123  ;;  %v610_v44 = vadd.f32 1e-05, %v578_v17  ;;  %v595_v59 = vadd.f32 1e-05, %v563_v18  ;;  %v678_v24 = vmul.f32 %v1122_v43, %v1527_v25 }
 0x291   :  { %978 = vmatpush3.xpose.msra.mxu1 %v775_v60  ;;  %v530_v55 = vpop.xlane.xlu0 %529  ;;  %v500_v15 = vpop.xlane.xlu1 %499  ;;  %v742_v51 = vadd.f32 %v1603_v49, %v703_v56  ;;  %v757_v45 = vadd.f32 %v1603_v49, %v718_v21  ;;  %v663_v46 = vmul.f32 %v1124_v20, %v1520_v23 }
 0x292   :  { %1137 = vrsqrt.f32 %v610_v44  ;;  %v577_v19 = vmul.f32 0.0078125, %v530_v55  ;;  %979 = vmatprep.subr.mxu1 %v790_v6  ;;  %v562_v36 = vmul.f32 0.0078125, %v500_v15  ;;  %v717_v57 = vmul.f32 %v1597_v52, %v678_v24 }
 0x293   :  { %v1126_v50 = vpop.eup %1125  ;;  %1139 = vrsqrt.f32 %v595_v59  ;;  %v774_v58 = vmax.f32 %v742_v51, 0.0  ;;  %v789_v37 = vmax.f32 %v757_v45, 0.0  ;;  %v702_v25 = vmul.f32 %v1597_v52, %v663_v46 }
 0x294   :  { %v1128_v14 = vpop.eup %1127  ;;  %v609_v4 = vadd.f32 1e-05, %v577_v19  ;;  %v594_v3 = vadd.f32 1e-05, %v562_v36  ;;  %v756_v61 = vadd.f32 %v1603_v49, %v717_v57  ;;  %v677_v38 = vmul.f32 %v1126_v50, %v1537_v27 }
 0x295   :  { %980 = vmatpush3.xpose.msra.mxu1 %v774_v58  ;;  %v498_v23 = vpop.xlane.xlu1 %497  ;;  %v741_v0 = vadd.f32 %v1603_v49, %v702_v25  ;;  %v662_v63 = vmul.f32 %v1128_v14, %v1530_v26 }
 0x296   :  { %1141 = vrsqrt.f32 %v609_v4  ;;  %981 = vmatprep.subr.mxu1 %v789_v37  ;;  %v561_v1 = vmul.f32 0.0078125, %v498_v23  ;;  %v788_v62 = vmax.f32 %v756_v61, 0.0  ;;  %v716_v2 = vmul.f32 %v1597_v52, %v677_v38 }
 0x297   :  { %v1130_v39 = vpop.eup %1129  ;;  %1143 = vrsqrt.f32 %v594_v3  ;;  %v773_v53 = vmax.f32 %v741_v0, 0.0  ;;  %v701_v5 = vmul.f32 %v1597_v52, %v662_v63  ;;  %v1217_v61 = vmov 1966171168  }
 0x298   :  { %v1132_v48 = vpop.eup %1131  ;;  %v593_v40 = vadd.f32 1e-05, %v561_v1  ;;  %v755_v27 = vadd.f32 %v1603_v49, %v716_v2  ;;  %v676_v8 = vmul.f32 %v1130_v39, %v1547_v29  ;;  %v877_v38 = vunpack.c.l.s4 %v1217_v61 }
 0x299   :  { %982 = vmatpush3.xpose.msra.mxu1 %v773_v53  ;;  %v740_v26 = vadd.f32 %v1603_v49, %v701_v5  ;;  %v661_v12 = vmul.f32 %v1132_v48, %v1540_v28  ;;  %v879_v23 = vlaneseq  ;;  %v801_v63 = vstv %s1713_s6 }
 0x29a   :  { %1145 = vrsqrt.f32 %v593_v40  ;;  %983 = vmatprep.subr.mxu1 %v788_v62  ;;  %v787_v9 = vmax.f32 %v755_v27, 0.0  ;;  %v715_v10 = vmul.f32 %v1597_v52, %v676_v8 }
 0x29b   :  { %v1134_v22 = vpop.eup %1133  ;;  %v772_v41 = vmax.f32 %v740_v26, 0.0  ;;  %v700_v13 = vmul.f32 %v1597_v52, %v661_v12  ;;  %v880_v0 = vshrl.u32 %v879_v23, 7  ;;  %vm893_vm0 = vcmp.lt.s32.totalorder %v879_v23, 256 }
 0x29c   :  { %v1136_v7 = vpop.eup %1135  ;;  %v754_v11 = vadd.f32 %v1603_v49, %v715_v10  ;;  %v675_v42 = vmul.f32 %v1134_v22, %v1557_v31 }
 0x29d   :  { %984 = vmatpush3.xpose.msra.mxu1 %v772_v41  ;;  %v739_v29 = vadd.f32 %v1603_v49, %v700_v13  ;;  %v660_v16 = vmul.f32 %v1136_v7, %v1550_v30 }
 0x29e   :  { %985 = vmatprep.subr.mxu1 %v787_v9  ;;  %v786_v28 = vmax.f32 %v754_v11, 0.0  ;;  %v714_v17 = vmul.f32 %v1597_v52, %v675_v42 }
 0x29f   :  { %v1138_v18 = vpop.eup %1137  ;;  %v771_v6 = vmax.f32 %v739_v29, 0.0  ;;  %v699_v43 = vmul.f32 %v1597_v52, %v660_v16 }
 0x2a0   :  { %v1140_v60 = vpop.eup %1139  ;;  %v753_v56 = vadd.f32 %v1603_v49, %v714_v17  ;;  %v674_v21 = vmul.f32 %v1138_v18, %v1567_v33 }
 0x2a1   :  { %986 = vmatpush3.xpose.msra.mxu1 %v771_v6  ;;  %v738_v31 = vadd.f32 %v1603_v49, %v699_v43  ;;  %v659_v20 = vmul.f32 %v1140_v60, %v1560_v32 }
 0x2a2   :  { %987 = vmatprep.subr.mxu1 %v786_v28  ;;  %v785_v30 = vmax.f32 %v753_v56, 0.0  ;;  %v713_v44 = vmul.f32 %v1597_v52, %v674_v21 }
 0x2a3   :  { %v1142_v59 = vpop.eup %1141  ;;  %v770_v24 = vmax.f32 %v738_v31, 0.0  ;;  %v698_v55 = vmul.f32 %v1597_v52, %v659_v20 }
 0x2a4   :  { %v1144_v15 = vpop.eup %1143  ;;  %v752_v51 = vadd.f32 %v1603_v49, %v713_v44  ;;  %v673_v45 = vmul.f32 %v1142_v59, %v1577_v35 }
 0x2a5   :  { %988 = vmatpush3.xpose.msra.mxu1 %v770_v24  ;;  %v737_v33 = vadd.f32 %v1603_v49, %v698_v55  ;;  %v658_v46 = vmul.f32 %v1144_v15, %v1570_v34 }
 0x2a6   :  { %989 = vmatprep.subr.mxu1 %v785_v30  ;;  %v784_v32 = vmax.f32 %v752_v51, 0.0  ;;  %v712_v19 = vmul.f32 %v1597_v52, %v673_v45 }
 0x2a7   :  { %v1146_v36 = vpop.eup %1145  ;;  %v769_v57 = vmax.f32 %v737_v33, 0.0  ;;  %v697_v50 = vmul.f32 %v1597_v52, %v658_v46 }
 0x2a8   :  { %v751_v58 = vadd.f32 %v1603_v49, %v712_v19  ;;  %v657_v37 = vmul.f32 %v1146_v36, %v1580_v54  ;;  %v878_v54 = vunpack.c.0.s8 %v877_v38 }
 0x2a9   :  { %990 = vmatpush3.xpose.msra.mxu1 %v769_v57  ;;  %v736_v35 = vadd.f32 %v1603_v49, %v697_v50 }
 0x2aa   :  { %991 = vmatprep.subr.mxu1 %v784_v32  ;;  %v783_v25 = vmax.f32 %v751_v58, 0.0  ;;  %v696_v14 = vmul.f32 %v1597_v52, %v657_v37 }
 0x2ab   :  { %v768_v34 = vmax.f32 %v736_v35, 0.0 }
 0x2ac   :  { %v735_v4 = vadd.f32 %v1603_v49, %v696_v14  ;;  %v881_v49 = vsub.s32 %v878_v54, %v880_v0 }
 0x2ad   :  { %992 = vmatpush3.xpose.msra.mxu1 %v768_v34 }
 0x2ae   :  { %993 = vmatprep.subr.mxu1 %v783_v25  ;;  %v767_v3 = vmax.f32 %v735_v4, 0.0 }
 0x2b1   :  { %994 = vmatpush3.xpose.msra.mxu1 %v767_v3 }
 0x2b4   :  { %996 = vmatmul.mubr.f32.vlgmr.msra.gmra.mxu1 %v1591_v47 }
 0x374   :  { %v868_v1 = vpop.f32.mrf.mxu1 }
 0x375   :  { %v869_v62 = vadd.f32 %v868_v1, %v801_v63 }
 0x376   :  { %v870_v52 = vpop.f32.mrf.mxu1 }
 0x377   :  { %v871_v2 = vadd.f32 %v870_v52, %v801_v63 }
 0x379   :  { %v875_v39 = vcombine.low %v869_v62, %v871_v2 }
 0x37b   :  { %v882_v53 = vrot.slane %v875_v39, %v881_v49 }
 0x37d   :  { %v889_v47 = vrot.slane %v882_v53, %v881_v49 }
 0x37f   :  { %895 = vst.msk [vmem:[#allocation8] sm:$0x3] %vm893_vm0, %v889_v47 }
 0x380   :  { %1198 = shalt.err (!%p1195_p0)
}
 0x381   :  { %905 = dma.vmem_to_hbm [thread:$0]  %s903_s18, 32, %s1714_s7, [#allocation5]  }
 0x382   :  { %1211 = dma.done.wait [#allocation5], 32  }
 0x383   :  { %1212 = vsyncadd [#allocation5], 4294967264 }
 0x384   :  { %909 = vsyncpa [#allocation4], 1 }
 0x385   :  { %910 = vsyncpa [#allocation7], 1 }
 0x386   :  { %911 = vsyncpa [#allocation5], 1 }

</bundles_post_ra>
